<compile_context>
chip_gen: v5e
topology: v5e:2x2
jax: 0.10.0
libtpu: 0.0.40
codegen_flags: <defaults>
</compile_context>

<pallas_src>
import jax
import jax.numpy as jnp
import numpy as np
from jax import lax
from jax.experimental import pallas as pl
from jax.experimental.pallas import tpu as pltpu

H = W = 128  # fixed by nn.Linear(in_features * 128 * 128, out_features)


# --------------------------------------------------------------------------
# One-off probe: does pltpu.roll follow jnp.roll's shift convention?
# (result is cached; guarantees the boundary masks land on the wrapped edge)
# --------------------------------------------------------------------------
_ROLL_SIGNS = None


def _probe_roll_sign(axis):
    shape = (16, 256)

    def k(x_ref, o_ref):
        o_ref[...] = pltpu.roll(x_ref[...], 1, axis)

    x = jax.random.normal(jax.random.PRNGKey(123 + axis), shape, jnp.float32)
    y = pl.pallas_call(k, out_shape=jax.ShapeDtypeStruct(shape, jnp.float32))(x)
    same = np.allclose(np.asarray(y), np.asarray(jnp.roll(x, 1, axis)))
    return 1 if same else -1


def _roll_signs():
    global _ROLL_SIGNS
    if _ROLL_SIGNS is None:
        _ROLL_SIGNS = (_probe_roll_sign(0), _probe_roll_sign(1))
    return _ROLL_SIGNS


# --------------------------------------------------------------------------
# Fused kernel factory (all shapes / channel counts are static Python ints)
# --------------------------------------------------------------------------
def _make_kernel(chans, cmax, out_features, roll_signs):
    n_layers = len(chans) - 1
    c_last = chans[-1]
    sgn = roll_signs

    def shift(p, delta, axis):
        # q[i] = p[i + delta] along `axis`, zero-filled at the boundary.
        if delta == 0:
            return p
        size = p.shape[axis]
        amt = (sgn[axis] * (-delta)) % size          # non-negative static shift
        rolled = pltpu.roll(p, amt, axis)
        idx = lax.broadcasted_iota(jnp.int32, p.shape, axis)
        if delta > 0:
            keep = idx < (size - delta)              # wrapped entries at high end
        else:
            keep = idx >= (-delta)                   # wrapped entries at low end
        return jnp.where(keep, rolled, 0.0)

    def kernel(w_sref, b_sref,                 # scalar-prefetched SMEM tables
               x_ref, fcw_ref, fcb_ref,        # VMEM inputs
               out_ref,                        # VMEM output (1, 1, OUT)
               buf0, buf1, tap_ref):           # VMEM scratch
        bufs = (buf0, buf1)

        for l in range(n_layers):
            cin, cout = chans[l], chans[l + 1]
            dst = bufs[l % 2]
            if l == 0:
                load_src = lambda ci: x_ref[0, ci]            # noqa: E731
            else:
                src = bufs[(l - 1) % 2]
                load_src = lambda ci, src=src: src[ci]        # noqa: E731
            wbase = l * 9 * cmax * cmax
            bbase = l * cmax

            for ci in range(cin):
                # Stage this input channel's 9 shifted taps once (lane-dense,
                # aligned); reuse them for every output channel.
                a = load_src(ci)                               # (H, W) f32
                rows = [shift(a, dy - 1, 0) for dy in range(3)]
                for dy in range(3):
                    for dx in range(3):
                        tap_ref[dy * 3 + dx] = shift(rows[dy], dx - 1, 1)

                is_first = ci == 0
                is_last = ci == cin - 1

                def co_body(co, carry, *, ci=ci, is_first=is_first,
                            is_last=is_last, wbase=wbase, bbase=bbase,
                            dst=dst):
                    if is_first:
                        # Fold bias into the first input-channel pass.
                        acc = jnp.full((H, W), b_sref[bbase + co], jnp.float32)
                    else:
                        acc = dst[co]
                    for t in range(9):
                        wv = w_sref[wbase + (t * cmax + ci) * cmax + co]
                        acc = acc + wv * tap_ref[t]
                    if is_last:
                        acc = jnp.maximum(acc, 0.0)            # fused ReLU
                    dst[co] = acc
                    return carry

                lax.fori_loop(0, cout, co_body, 0, unroll=2)

        # ---- fused fully-connected head ----------------------------------
        # fcw_ref is (OUT, C_last, H, W): torch.flatten's NCHW (C,H,W) order
        # is already folded into the weight layout by the wrapper.
        final = bufs[(n_layers - 1) % 2]
        row = fcb_ref[...]                                     # (1, OUT) f32
        lane = lax.broadcasted_iota(jnp.int32, (1, out_features), 1)
        for o in range(out_features):
            plane = final[0] * fcw_ref[o, 0]
            for c in range(1, c_last):
                plane = plane + final[c] * fcw_ref[o, c]
            s = jnp.sum(jnp.sum(plane, axis=1, keepdims=True),
                        axis=0, keepdims=True)                 # (1, 1)
            row = row + s * (lane == o).astype(jnp.float32)
        out_ref[0] = row

    return kernel


# --------------------------------------------------------------------------
# Net forward: one fused pallas_call for conv1..conv6 (+ReLU) and fc1
# --------------------------------------------------------------------------
def net_forward(x_nchw, params):
    n, c0 = x_nchw.shape[0], x_nchw.shape[1]
    assert x_nchw.shape[2] == H and x_nchw.shape[3] == W, "fc1 implies 128x128"
    convs = params["convs"]
    n_layers = len(convs)
    chans = [c0] + [wc.shape[3] for (wc, _) in convs]
    cmax = max(chans)
    c_last = chans[-1]
    out_features = params["fc_b"].shape[0]

    # Pack conv weights/biases into flat zero-padded SMEM tables (tiny).
    w_tab = jnp.zeros((n_layers, 9, cmax, cmax), jnp.float32)
    b_tab = jnp.zeros((n_layers, cmax), jnp.float32)
    for l, (wc, bc) in enumerate(convs):
        cin, cout = wc.shape[2], wc.shape[3]
        w_tab = w_tab.at[l, :, :cin, :cout].set(
            wc.reshape(9, cin, cout).astype(jnp.float32))
        b_tab = b_tab.at[l, :cout].set(bc.astype(jnp.float32))
    w_flat = w_tab.reshape(-1)
    b_flat = b_tab.reshape(-1)

    # Fold torch.flatten's (C, H, W) ordering into the FC weights (uses the
    # last conv's channel count, not the input channel count).
    fcw = params["fc_w"].T.reshape(out_features, c_last, H, W).astype(jnp.float32)
    fcb = params["fc_b"].reshape(1, out_features).astype(jnp.float32)

    # Ping-pong buffer capacities: layer l writes bufs[l % 2].
    cmax0 = max(chans[l + 1] for l in range(0, n_layers, 2))
    cmax1 = max(chans[l + 1] for l in range(1, n_layers, 2)) if n_layers > 1 else 1

    kernel = _make_kernel(tuple(chans), cmax, out_features, _roll_signs())
    grid_spec = pltpu.PrefetchScalarGridSpec(
        num_scalar_prefetch=2,                 # conv weights + biases -> SMEM
        grid=(n,),                             # one sample per grid step
        in_specs=[
            pl.BlockSpec((1, c0, H, W), lambda i, *_: (i, 0, 0, 0)),
            pl.BlockSpec((out_features, c_last, H, W), lambda i, *_: (0, 0, 0, 0)),
            pl.BlockSpec((1, out_features), lambda i, *_: (0, 0)),
        ],
        out_specs=pl.BlockSpec((1, 1, out_features), lambda i, *_: (i, 0, 0)),
        scratch_shapes=[
            pltpu.VMEM((cmax0, H, W), jnp.float32),   # ping activations (f32)
            pltpu.VMEM((cmax1, H, W), jnp.float32),   # pong activations (f32)
            pltpu.VMEM((9, H, W), jnp.float32),       # staged 3x3 taps
        ],
    )
    out = pl.pallas_call(
        kernel,
        out_shape=jax.ShapeDtypeStruct((n, 1, out_features), jnp.float32),
        grid_spec=grid_spec,
        compiler_params=pltpu.CompilerParams(
            dimension_semantics=("parallel",)),   # batch-parallel grid
    )(w_flat, b_flat, x_nchw, fcw, fcb)
    return out.reshape(n, out_features)


# --------------------------------------------------------------------------
# Deterministic synthetic parameters (shapes from Net.__init__)
# --------------------------------------------------------------------------
def init_params(key, in_features, out_features):
    chans = [in_features, in_features * 2, in_features * 4, in_features * 8,
             in_features * 4, in_features * 2, in_features]
    convs = []
    for i in range(6):
        cin, cout = chans[i], chans[i + 1]
        key, k1, k2 = jax.random.split(key, 3)
        scale = 1.0 / np.sqrt(cin * 9)
        wc = jax.random.normal(k1, (3, 3, cin, cout), jnp.float32) * scale
        bc = jax.random.normal(k2, (cout,), jnp.float32) * scale
        convs.append((wc, bc))
    kfc = in_features * H * W
    key, k1, k2 = jax.random.split(key, 3)
    scale = 1.0 / np.sqrt(kfc)
    fc_w = jax.random.normal(k1, (kfc, out_features), jnp.float32) * scale
    fc_b = jax.random.normal(k2, (out_features,), jnp.float32) * scale
    return {"convs": convs, "fc_w": fc_w, "fc_b": fc_b}


# --------------------------------------------------------------------------
# Pure-JAX reference (for correctness check)
# --------------------------------------------------------------------------
def reference_forward(x_nchw, params):
    x = x_nchw
    for (wc, bc) in params["convs"]:
        y = lax.conv_general_dilated(
            x, wc, window_strides=(1, 1), padding=((1, 1), (1, 1)),
            dimension_numbers=("NCHW", "HWIO", "NCHW"),
            precision=lax.Precision.HIGHEST)
        x = jax.nn.relu(y + bc[None, :, None, None])
    feats = x.reshape(x.shape[0], -1)
    return (jnp.dot(feats, params["fc_w"], precision=lax.Precision.HIGHEST)
            + params["fc_b"])


if __name__ == "__main__":
    in_features, out_features, batch = 2, 8, 2
    key = jax.random.PRNGKey(0)
    kx, kp = jax.random.split(key)
    x = jax.random.normal(kx, (batch, in_features, H, W), jnp.float32)
    params = init_params(kp, in_features, out_features)

    _roll_signs()   # probe pltpu.roll's convention once, outside jit

    out = jax.jit(net_forward)(x, params)
    out = jax.block_until_ready(out)

    ref = reference_forward(x, params)
    np.testing.assert_allclose(np.asarray(out), np.asarray(ref),
                               rtol=1e-2, atol=1e-2)
    print("KERNEL_OK")
</pallas_src>

<mosaic_0001>
module attributes {stable_mosaic.version = 11 : i64} {
  func.func @k(%arg0: memref<16x256xf32, #tpu.memory_space<vmem>>, %arg1: memref<16x256xf32, #tpu.memory_space<vmem>>) attributes {dimension_semantics = [], scalar_prefetch = 0 : i64, scratch_operands = 0 : i64, tpu.core_type = #tpu.core_type<tc>} {
    %c0 = arith.constant 0 : index
    %c0_0 = arith.constant 0 : index
    %0 = vector.load %arg0[%c0, %c0_0] : memref<16x256xf32, #tpu.memory_space<vmem>>, vector<16x256xf32>
    %c1_i32 = arith.constant 1 : i32
    %1 = tpu.dynamic_rotate %0 by %c1_i32 dim 0 : vector<16x256xf32>, i32 -> vector<16x256xf32>
    %c0_1 = arith.constant 0 : index
    %c0_2 = arith.constant 0 : index
    %2 = vector.load %arg1[%c0_1, %c0_2] : memref<16x256xf32, #tpu.memory_space<vmem>>, vector<16x256xf32>
    tpu.vector_store %arg1[%c0_1, %c0_2], %1 {strides = array<i32>} : memref<16x256xf32, #tpu.memory_space<vmem>>, vector<16x256xf32>,
    return
  }
}

</mosaic_0001>

<bundles_post_ra>
// kernel: tpu_custom_call.1
= control target key start
LH: loop header
LB: loop body
LE: loop exit
PB: predicated region body
PF: predicated region fallthrough
CT: control target
= control target key end

     0   :  { %6 = vsyncpa [#allocation3], 0  ;;  %s145_s0 = inlined_call_operand.hbm [shape: f32[16,256], index: 0, kind: input, shape index: {}]   ;;  %s146_s1 = inlined_call_operand.hbm [shape: f32[16,256], index: 1, kind: output, shape index: {}]  }
   0x1   :  { %7 = vsyncpa [#allocation4], 0  ;;  %s12_s8 = sshll.u32 %s145_s0, 4  ;;  %s119_s9 = smov [#allocation2]   ;;  %s13_s8 = int_to_ptr.hbm [resolvable:$true] %s12_s8 }
   0x2   :  { %s14_s10 = sshll.u32 %s119_s9, 4  ;;  %s120_s11 = smov 256   ;;  %s15_s10 = int_to_ptr.vmem [resolvable:$true] %s14_s10 }
   0x3   :  { %s121_s12 = smov 16  }
   0x4   :  { %20 = dma.hbm_to_vmem [thread:$0]  %s13_s8, 512, %s15_s10, [#allocation3], %s120_s11, %s120_s11, %s121_s12  }
   0x5   :  { %115 = dma.done.wait [#allocation3], 512  }
   0x6   :  { %116 = vsyncadd [#allocation3], 4294966784  ;;  %v33_v0 = vlaneseq  ;;  %v25_v2 = vld [vmem:[#allocation2] sm:$0xff]  ;;  %v27_v3 = vld [vmem:[#allocation2 + $0x10] sm:$0xff]  ;;  %s122_s0 = smov [#allocation5]   ;;  %s50_s16 = sshll.u32 %s146_s1, 4  ;;  %s51_s16 = int_to_ptr.hbm [resolvable:$true] %s50_s16 }
   0x7   :  { %v26_v4 = vld [vmem:[#allocation2 + $0x8] sm:$0xff]  ;;  %v29_v5 = vrot.slane %v25_v2, 7  ;;  %v31_v6 = vrot.slane %v27_v3, 7  ;;  %v28_v7 = vld [vmem:[#allocation2 + $0x18] sm:$0xff]  ;;  %s48_s13 = sshll.u32 %s122_s0, 4  ;;  %s49_s13 = int_to_ptr.vmem [resolvable:$true] %s48_s13 }
   0x8   :  { %v34_v1 = vshrl.u32 %v33_v0, 7  ;;  %v30_v8 = vrot.slane %v26_v4, 7  ;;  %v32_v9 = vrot.slane %v28_v7, 7 }
   0xa   :  { %vm35_vm0 = vcmp.lt.s32.totalorder %v34_v1, 1 }
   0xb   :  { %v38_v10 = vsel %vm35_vm0, %v31_v6, %v29_v5  ;;  %v36_v11 = vsel %vm35_vm0, %v29_v5, %v31_v6  ;;  %v39_v12 = vsel %vm35_vm0, %v32_v9, %v30_v8  ;;  %v37_v13 = vsel %vm35_vm0, %v30_v8, %v32_v9 }
   0xc   :  { %40 = vst [vmem:[#allocation5] sm:$0xff] %v38_v10 }
   0xd   :  { %41 = vst [vmem:[#allocation5 + $0x8] sm:$0xff] %v39_v12 }
   0xe   :  { %42 = vst [vmem:[#allocation5 + $0x10] sm:$0xff] %v36_v11 }
   0xf   :  { %43 = vst [vmem:[#allocation5 + $0x18] sm:$0xff] %v37_v13 }
  0x10   :  { %56 = dma.vmem_to_hbm [thread:$0]  %s49_s13, 512, %s51_s16, [#allocation4], %s120_s11, %s120_s11, %s121_s12  }
  0x11   :  { %117 = dma.done.wait [#allocation4], 512  }
  0x12   :  { %118 = vsyncadd [#allocation4], 4294966784 }
  0x13   :  { %61 = vsyncpa [#allocation3], 1 }
  0x14   :  { %62 = vsyncpa [#allocation4], 1 }

</bundles_post_ra>
